<compile_context>
chip_gen: v7x
topology: tpu7x:2x2x1
jax: 0.10.0
libtpu: 0.0.40
codegen_flags: <defaults>
</compile_context>

<pallas_src>
import functools

import jax
import jax.numpy as jnp
from jax.experimental import pallas as pl
from jax.experimental.pallas import tpu as pltpu

LN_EPS = 1e-12


def _bert_self_output_kernel(x_ref, wt_ref, p_ref, res_ref, o_ref):
    # x_ref:   (tm, H)  activation row-block (native / matmul dtype)
    # wt_ref:  (H, H)   dense weight, pre-transposed (in, out), grid-invariant
    # p_ref:   (3, H)   packed f32 params: row 0 = bias, row 1 = gamma, row 2 = beta
    # res_ref: (tm, H)  residual (input_tensor) row-block
    # o_ref:   (tm, H)  output row-block

    # Dense: x @ W^T on the MXU, f32 accumulation.
    h = jnp.dot(x_ref[...], wt_ref[...], preferred_element_type=jnp.float32)

    # TODO(synk): dropout omitted (inference / eval semantics -> identity).

    bias = p_ref[0:1, :]
    gamma = p_ref[1:2, :]
    beta = p_ref[2:3, :]

    # Bias + residual add; all math f32 from here.
    y = h + bias + res_ref[...].astype(jnp.float32)

    # Single-pass LayerNorm over the hidden axis.  Clamp the variance at 0:
    # E[y^2]-E[y]^2 can cancel to a tiny negative value in f32 -> rsqrt NaN otherwise.
    inv_h = 1.0 / y.shape[-1]
    mean = jnp.sum(y, axis=-1, keepdims=True) * inv_h
    meansq = jnp.sum(y * y, axis=-1, keepdims=True) * inv_h
    var = jnp.maximum(meansq - mean * mean, 0.0)
    inv = jax.lax.rsqrt(var + LN_EPS)
    out = (y - mean) * (inv * gamma) + beta

    o_ref[...] = out.astype(o_ref.dtype)


def _round_up(x, m):
    return ((x + m - 1) // m) * m


def _pick_row_tile(M, block_m):
    # Largest legal (8-aligned) row tile <= block_m.
    tm = min(block_m, _round_up(M, 8))
    # Megacore (v7x, 2 TCs): keep the "parallel" grid at >= 2 blocks so neither core
    # idles.  No effect on single-TC v5e/v6e beyond a second (cheap) grid step.
    if M > 8:
        tm = min(tm, _round_up(pl.cdiv(M, 2), 8))
    return max(tm, 8)


def _vmem_limit_bytes(tm, H, act_itemsize, w_itemsize, out_itemsize, w_bufs):
    # Actual buffer usage of this kernel (double-buffered streams + resident weight +
    # f32 intermediates), with 1.5x headroom + compiler-internal scratch.
    need = (
        2 * 2 * tm * H * act_itemsize      # x + residual, double-buffered
        + 2 * tm * H * out_itemsize        # output, double-buffered
        + w_bufs * H * H * w_itemsize      # W^T (single-buffered when supported)
        + 2 * 3 * H * 4                    # packed LN params
        + 3 * tm * H * 4                   # f32 h / y / normalized temporaries
    )
    need = (need * 3) // 2 + (4 << 20)
    try:
        physical = int(pltpu.get_tpu_info().vmem_capacity_bytes)
    except Exception:
        physical = 64 * 1024 * 1024        # v7x per-TC VMEM = smallest across generations
    return int(min(max(need, 16 * 1024 * 1024), (physical * 7) // 8))


@functools.partial(
    jax.jit, static_argnames=("block_m", "matmul_dtype", "single_buffer_invariants"))
def bert_self_output(hidden_states, input_tensor, weight_t, bias, gamma, beta,
                     block_m=512, matmul_dtype=None, single_buffer_invariants=True):
    """hidden_states, input_tensor: [B, S, H]; weight_t: [H_in, H_out]
    (PyTorch nn.Linear weight [out, in] transposed ONCE at load time).

    block_m: row tile; sweep 256/512/1024 (mem-bound v6e/v7x favor bigger tiles).
    matmul_dtype: e.g. jnp.bfloat16 to stream activations/residual/weight in bf16
      (f32 accumulation + f32 LayerNorm are kept).  None = native dtype.
    """
    B, S, H = hidden_states.shape
    M = B * S
    out_dtype = hidden_states.dtype

    x2d = hidden_states.reshape(M, H)
    res2d = input_tensor.reshape(M, H)
    w = weight_t
    if matmul_dtype is not None:
        # In a real model the bf16 weight would be stored pre-cast at load time.
        x2d = x2d.astype(matmul_dtype)
        res2d = res2d.astype(matmul_dtype)
        w = w.astype(matmul_dtype)

    # Pack the three tiny per-feature vectors into one (3, H) f32 operand: one DMA,
    # one BlockSpec buffer, no per-iteration casts inside the kernel.
    params = jnp.stack(
        [bias.astype(jnp.float32), gamma.astype(jnp.float32), beta.astype(jnp.float32)],
        axis=0)

    tm = _pick_row_tile(M, block_m)
    grid = (pl.cdiv(M, tm),)
    # NOTE: when M % tm != 0, the padded rows of the last block run garbage through the
    # LN; those lanes are discarded, so outputs are correct (may trip NaN checkers only).

    act_isize = jnp.dtype(x2d.dtype).itemsize
    w_isize = jnp.dtype(w.dtype).itemsize
    out_isize = jnp.dtype(out_dtype).itemsize

    # Grid-invariant operands: a second pipeline buffer is never used, so request a
    # single buffer (saves H*H*itemsize of dead VMEM — matters most on v7x's 64 MiB).
    if single_buffer_invariants:
        wt_spec = pl.BlockSpec((H, H), lambda i: (0, 0), pipeline_mode=pl.Buffered(1))
        p_spec = pl.BlockSpec((3, H), lambda i: (0, 0), pipeline_mode=pl.Buffered(1))
        w_bufs = 1
    else:
        wt_spec = pl.BlockSpec((H, H), lambda i: (0, 0))
        p_spec = pl.BlockSpec((3, H), lambda i: (0, 0))
        w_bufs = 2

    cost = pl.CostEstimate(
        flops=2 * M * H * H,
        transcendentals=M,  # one rsqrt per row
        bytes_accessed=(2 * M * H * act_isize       # x + residual read
                        + M * H * out_isize         # output write
                        + H * H * w_isize           # weight read
                        + 3 * H * 4),               # packed params read
    )

    out2d = pl.pallas_call(
        _bert_self_output_kernel,
        out_shape=jax.ShapeDtypeStruct((M, H), out_dtype),
        grid_spec=pltpu.PrefetchScalarGridSpec(
            num_scalar_prefetch=0,
            grid=grid,
            in_specs=[
                pl.BlockSpec((tm, H), lambda i: (i, 0)),   # x row-block
                wt_spec,                                   # W^T (resident, 1 buffer)
                p_spec,                                    # bias/gamma/beta (f32)
                pl.BlockSpec((tm, H), lambda i: (i, 0)),   # residual row-block
            ],
            out_specs=pl.BlockSpec((tm, H), lambda i: (i, 0)),
        ),
        compiler_params=pltpu.CompilerParams(
            dimension_semantics=("parallel",),
            vmem_limit_bytes=_vmem_limit_bytes(tm, H, act_isize, w_isize,
                                               out_isize, w_bufs),
        ),
        cost_estimate=cost,
    )(x2d, w, params, res2d)

    return out2d.reshape(B, S, H)


def _reference(hidden_states, input_tensor, weight, bias, gamma, beta):
    h = jnp.einsum("bsh,oh->bso", hidden_states, weight) + bias
    y = h + input_tensor
    mean = jnp.mean(y, axis=-1, keepdims=True)
    var = jnp.mean((y - mean) ** 2, axis=-1, keepdims=True)
    return (y - mean) / jnp.sqrt(var + LN_EPS) * gamma + beta


if __name__ == "__main__":
    # Small BERT-like config: batch=2, seq=8, hidden=32
    B, S, H = 2, 8, 32
    key = jax.random.PRNGKey(0)
    k1, k2, k3, k4 = jax.random.split(key, 4)

    hidden_states = jax.random.normal(k1, (B, S, H), dtype=jnp.float32)
    input_tensor = jax.random.normal(k2, (B, S, H), dtype=jnp.float32)

    # nn.Linear weight [out, in], bias [out]; BertLayerNorm gamma=1, beta=0.
    weight = jax.random.normal(k3, (H, H), dtype=jnp.float32) * (1.0 / jnp.sqrt(H))
    bias = jax.random.normal(k4, (H,), dtype=jnp.float32) * 0.02
    gamma = jnp.ones((H,), dtype=jnp.float32)
    beta = jnp.zeros((H,), dtype=jnp.float32)

    # One-time preprocessing: PyTorch [out, in] -> [in, out] for the row-major matmul.
    weight_t = jnp.asarray(weight.T)

    def run(**kw):
        try:
            return jax.block_until_ready(bert_self_output(
                hidden_states, input_tensor, weight_t, bias, gamma, beta,
                single_buffer_invariants=True, **kw))
        except Exception:
            # Graceful degradation if this jax/libtpu rejects pipeline_mode=Buffered(1):
            # fall back to default double-buffering of the invariant operands.
            return jax.block_until_ready(bert_self_output(
                hidden_states, input_tensor, weight_t, bias, gamma, beta,
                single_buffer_invariants=False, **kw))

    ref = _reference(hidden_states, input_tensor, weight, bias, gamma, beta)

    # Native-f32 path (tight check).
    out = run()
    assert out.shape == (B, S, H)
    assert jnp.allclose(out, ref, atol=1e-4, rtol=1e-4), "f32 mismatch vs reference"

    # bf16-matmul path (halves streamed HBM bytes; dominant lever on v5e's MXU bound).
    out_bf16 = run(matmul_dtype=jnp.bfloat16)
    assert out_bf16.shape == (B, S, H)
    assert jnp.allclose(out_bf16, ref, atol=2e-2, rtol=2e-2), "bf16 mismatch vs reference"

    print("KERNEL_OK")
</pallas_src>

<mosaic_0001>
module attributes {stable_mosaic.version = 11 : i64} {
  func.func @_bert_self_output_kernel(%arg0: i32, %arg1: memref<8x32xf32, #tpu.memory_space<vmem>>, %arg2: memref<32x32xf32, #tpu.memory_space<vmem>>, %arg3: memref<3x32xf32, #tpu.memory_space<vmem>>, %arg4: memref<8x32xf32, #tpu.memory_space<vmem>>, %arg5: memref<8x32xf32, #tpu.memory_space<vmem>>) attributes {dimension_semantics = [#tpu.dimension_semantics<parallel>], iteration_bounds = array<i64: 2>, scalar_prefetch = 0 : i64, scratch_operands = 0 : i64, tpu.core_type = #tpu.core_type<tc>, window_params = [{transform_indices = @transform_0, window_bounds = array<i64: 8, 32>}, {pipeline_mode = #tpu.pipeline_mode<synchronous>, transform_indices = @transform_1, window_bounds = array<i64: 32, 32>}, {pipeline_mode = #tpu.pipeline_mode<synchronous>, transform_indices = @transform_2, window_bounds = array<i64: 3, 32>}, {transform_indices = @transform_3, window_bounds = array<i64: 8, 32>}, {transform_indices = @transform_4, window_bounds = array<i64: 8, 32>}]} {
    %c0 = arith.constant 0 : index
    %c0_0 = arith.constant 0 : index
    %0 = vector.load %arg1[%c0, %c0_0] : memref<8x32xf32, #tpu.memory_space<vmem>>, vector<8x32xf32>
    %c0_1 = arith.constant 0 : index
    %c0_2 = arith.constant 0 : index
    %1 = vector.load %arg2[%c0_1, %c0_2] : memref<32x32xf32, #tpu.memory_space<vmem>>, vector<32x32xf32>
    %cst = arith.constant dense<0.000000e+00> : vector<8x32xf32>
    %2 = tpu.matmul %0, %1, %cst {dimension_numbers = #tpu.dot_dimension_numbers<[1], [0], [0], [1], [0, 0, 1, 1], [], []>} : vector<8x32xf32>, vector<32x32xf32>, vector<8x32xf32> -> vector<8x32xf32>
    %c0_3 = arith.constant 0 : index
    %c0_4 = arith.constant 0 : index
    %3 = vector.load %arg3[%c0_3, %c0_4] : memref<3x32xf32, #tpu.memory_space<vmem>>, vector<1x32xf32>
    %c1 = arith.constant 1 : index
    %c0_5 = arith.constant 0 : index
    %4 = vector.load %arg3[%c1, %c0_5] : memref<3x32xf32, #tpu.memory_space<vmem>>, vector<1x32xf32>
    %c2 = arith.constant 2 : index
    %c0_6 = arith.constant 0 : index
    %5 = vector.load %arg3[%c2, %c0_6] : memref<3x32xf32, #tpu.memory_space<vmem>>, vector<1x32xf32>
    %6 = vector.broadcast %3 : vector<1x32xf32> to vector<8x32xf32>
    %7 = arith.addf %2, %6 : vector<8x32xf32>
    %c0_7 = arith.constant 0 : index
    %c0_8 = arith.constant 0 : index
    %8 = vector.load %arg4[%c0_7, %c0_8] : memref<8x32xf32, #tpu.memory_space<vmem>>, vector<8x32xf32>
    %9 = arith.addf %7, %8 : vector<8x32xf32>
    %cst_9 = arith.constant dense<0.000000e+00> : vector<8xf32>
    %10 = vector.multi_reduction <add>, %9, %cst_9 [1] : vector<8x32xf32> to vector<8xf32>
    %11 = vector.shape_cast %10 : vector<8xf32> to vector<8x1xf32>
    %cst_10 = arith.constant 3.125000e-02 : f32
    %12 = vector.broadcast %cst_10 : f32 to vector<8x1xf32>
    %13 = arith.mulf %11, %12 : vector<8x1xf32>
    %14 = arith.mulf %9, %9 : vector<8x32xf32>
    %cst_11 = arith.constant dense<0.000000e+00> : vector<8xf32>
    %15 = vector.multi_reduction <add>, %14, %cst_11 [1] : vector<8x32xf32> to vector<8xf32>
    %16 = vector.shape_cast %15 : vector<8xf32> to vector<8x1xf32>
    %cst_12 = arith.constant 3.125000e-02 : f32
    %17 = vector.broadcast %cst_12 : f32 to vector<8x1xf32>
    %18 = arith.mulf %16, %17 : vector<8x1xf32>
    %19 = arith.mulf %13, %13 : vector<8x1xf32>
    %20 = arith.subf %18, %19 : vector<8x1xf32>
    %cst_13 = arith.constant 0.000000e+00 : f32
    %21 = vector.broadcast %cst_13 : f32 to vector<8x1xf32>
    %22 = arith.maximumf %20, %21 : vector<8x1xf32>
    %cst_14 = arith.constant 9.99999996E-13 : f32
    %23 = vector.broadcast %cst_14 : f32 to vector<8x1xf32>
    %24 = arith.addf %22, %23 : vector<8x1xf32>
    %25 = math.rsqrt %24 : vector<8x1xf32>
    %26 = vector.broadcast %13 : vector<8x1xf32> to vector<8x32xf32>
    %27 = arith.subf %9, %26 : vector<8x32xf32>
    %28 = vector.broadcast %25 : vector<8x1xf32> to vector<8x32xf32>
    %29 = vector.broadcast %4 : vector<1x32xf32> to vector<8x32xf32>
    %30 = arith.mulf %28, %29 : vector<8x32xf32>
    %31 = arith.mulf %27, %30 : vector<8x32xf32>
    %32 = vector.broadcast %5 : vector<1x32xf32> to vector<8x32xf32>
    %33 = arith.addf %31, %32 : vector<8x32xf32>
    %c0_15 = arith.constant 0 : index
    %c0_16 = arith.constant 0 : index
    %34 = vector.load %arg5[%c0_15, %c0_16] : memref<8x32xf32, #tpu.memory_space<vmem>>, vector<8x32xf32>
    tpu.vector_store %arg5[%c0_15, %c0_16], %33 {strides = array<i32>} : memref<8x32xf32, #tpu.memory_space<vmem>>, vector<8x32xf32>,
    return
  }
  func.func @transform_0(%arg0: i32) -> (i32, i32) {
    %c0_i32 = arith.constant 0 : i32
    %c0_i32_0 = arith.constant 0 : i32
    return %arg0, %c0_i32 : i32, i32
  }
  func.func @transform_1(%arg0: i32) -> (i32, i32) {
    %c0_i32 = arith.constant 0 : i32
    %c0_i32_0 = arith.constant 0 : i32
    %c0_i32_1 = arith.constant 0 : i32
    return %c0_i32, %c0_i32_0 : i32, i32
  }
  func.func @transform_2(%arg0: i32) -> (i32, i32) {
    %c0_i32 = arith.constant 0 : i32
    %c0_i32_0 = arith.constant 0 : i32
    %c0_i32_1 = arith.constant 0 : i32
    return %c0_i32, %c0_i32_0 : i32, i32
  }
  func.func @transform_3(%arg0: i32) -> (i32, i32) {
    %c0_i32 = arith.constant 0 : i32
    %c0_i32_0 = arith.constant 0 : i32
    return %arg0, %c0_i32 : i32, i32
  }
  func.func @transform_4(%arg0: i32) -> (i32, i32) {
    %c0_i32 = arith.constant 0 : i32
    %c0_i32_0 = arith.constant 0 : i32
    return %arg0, %c0_i32 : i32, i32
  }
}

module attributes {stable_mosaic.version = 11 : i64} {
  func.func @_bert_self_output_kernel(%arg0: i32, %arg1: memref<8x32xf32, #tpu.memory_space<vmem>>, %arg2: memref<32x32xf32, #tpu.memory_space<vmem>>, %arg3: memref<3x32xf32, #tpu.memory_space<vmem>>, %arg4: memref<8x32xf32, #tpu.memory_space<vmem>>, %arg5: memref<8x32xf32, #tpu.memory_space<vmem>>) attributes {dimension_semantics = [#tpu.dimension_semantics<parallel>], iteration_bounds = array<i64: 2>, scalar_prefetch = 0 : i64, scratch_operands = 0 : i64, tpu.core_type = #tpu.core_type<tc>, window_params = [{transform_indices = @transform_0, window_bounds = array<i64: 8, 32>}, {pipeline_mode = #tpu.pipeline_mode<synchronous>, transform_indices = @transform_1, window_bounds = array<i64: 32, 32>}, {pipeline_mode = #tpu.pipeline_mode<synchronous>, transform_indices = @transform_2, window_bounds = array<i64: 3, 32>}, {transform_indices = @transform_3, window_bounds = array<i64: 8, 32>}, {transform_indices = @transform_4, window_bounds = array<i64: 8, 32>}]} {
    %c0 = arith.constant 0 : index
    %c0_0 = arith.constant 0 : index
    %0 = vector.load %arg1[%c0, %c0_0] : memref<8x32xf32, #tpu.memory_space<vmem>>, vector<8x32xf32>
    %c0_1 = arith.constant 0 : index
    %c0_2 = arith.constant 0 : index
    %1 = vector.load %arg2[%c0_1, %c0_2] : memref<32x32xf32, #tpu.memory_space<vmem>>, vector<32x32xf32>
    %cst = arith.constant dense<0.000000e+00> : vector<8x32xf32>
    %2 = tpu.matmul %0, %1, %cst {dimension_numbers = #tpu.dot_dimension_numbers<[1], [0], [0], [1], [0, 0, 1, 1], [], []>} : vector<8x32xf32>, vector<32x32xf32>, vector<8x32xf32> -> vector<8x32xf32>
    %c0_3 = arith.constant 0 : index
    %c0_4 = arith.constant 0 : index
    %3 = vector.load %arg3[%c0_3, %c0_4] : memref<3x32xf32, #tpu.memory_space<vmem>>, vector<1x32xf32>
    %c1 = arith.constant 1 : index
    %c0_5 = arith.constant 0 : index
    %4 = vector.load %arg3[%c1, %c0_5] : memref<3x32xf32, #tpu.memory_space<vmem>>, vector<1x32xf32>
    %c2 = arith.constant 2 : index
    %c0_6 = arith.constant 0 : index
    %5 = vector.load %arg3[%c2, %c0_6] : memref<3x32xf32, #tpu.memory_space<vmem>>, vector<1x32xf32>
    %6 = vector.broadcast %3 : vector<1x32xf32> to vector<8x32xf32>
    %7 = arith.addf %2, %6 : vector<8x32xf32>
    %c0_7 = arith.constant 0 : index
    %c0_8 = arith.constant 0 : index
    %8 = vector.load %arg4[%c0_7, %c0_8] : memref<8x32xf32, #tpu.memory_space<vmem>>, vector<8x32xf32>
    %9 = arith.addf %7, %8 : vector<8x32xf32>
    %cst_9 = arith.constant dense<0.000000e+00> : vector<8xf32>
    %10 = vector.multi_reduction <add>, %9, %cst_9 [1] : vector<8x32xf32> to vector<8xf32>
    %11 = vector.shape_cast %10 : vector<8xf32> to vector<8x1xf32>
    %cst_10 = arith.constant 3.125000e-02 : f32
    %12 = vector.broadcast %cst_10 : f32 to vector<8x1xf32>
    %13 = arith.mulf %11, %12 : vector<8x1xf32>
    %14 = arith.mulf %9, %9 : vector<8x32xf32>
    %cst_11 = arith.constant dense<0.000000e+00> : vector<8xf32>
    %15 = vector.multi_reduction <add>, %14, %cst_11 [1] : vector<8x32xf32> to vector<8xf32>
    %16 = vector.shape_cast %15 : vector<8xf32> to vector<8x1xf32>
    %cst_12 = arith.constant 3.125000e-02 : f32
    %17 = vector.broadcast %cst_12 : f32 to vector<8x1xf32>
    %18 = arith.mulf %16, %17 : vector<8x1xf32>
    %19 = arith.mulf %13, %13 : vector<8x1xf32>
    %20 = arith.subf %18, %19 : vector<8x1xf32>
    %cst_13 = arith.constant 0.000000e+00 : f32
    %21 = vector.broadcast %cst_13 : f32 to vector<8x1xf32>
    %22 = arith.maximumf %20, %21 : vector<8x1xf32>
    %cst_14 = arith.constant 9.99999996E-13 : f32
    %23 = vector.broadcast %cst_14 : f32 to vector<8x1xf32>
    %24 = arith.addf %22, %23 : vector<8x1xf32>
    %25 = math.rsqrt %24 : vector<8x1xf32>
    %26 = vector.broadcast %13 : vector<8x1xf32> to vector<8x32xf32>
    %27 = arith.subf %9, %26 : vector<8x32xf32>
    %28 = vector.broadcast %25 : vector<8x1xf32> to vector<8x32xf32>
    %29 = vector.broadcast %4 : vector<1x32xf32> to vector<8x32xf32>
    %30 = arith.mulf %28, %29 : vector<8x32xf32>
    %31 = arith.mulf %27, %30 : vector<8x32xf32>
    %32 = vector.broadcast %5 : vector<1x32xf32> to vector<8x32xf32>
    %33 = arith.addf %31, %32 : vector<8x32xf32>
    %c0_15 = arith.constant 0 : index
    %c0_16 = arith.constant 0 : index
    %34 = vector.load %arg5[%c0_15, %c0_16] : memref<8x32xf32, #tpu.memory_space<vmem>>, vector<8x32xf32>
    tpu.vector_store %arg5[%c0_15, %c0_16], %33 {strides = array<i32>} : memref<8x32xf32, #tpu.memory_space<vmem>>, vector<8x32xf32>,
    return
  }
  func.func @transform_0(%arg0: i32) -> (i32, i32) {
    %c0_i32 = arith.constant 0 : i32
    %c0_i32_0 = arith.constant 0 : i32
    return %arg0, %c0_i32 : i32, i32
  }
  func.func @transform_1(%arg0: i32) -> (i32, i32) {
    %c0_i32 = arith.constant 0 : i32
    %c0_i32_0 = arith.constant 0 : i32
    %c0_i32_1 = arith.constant 0 : i32
    return %c0_i32, %c0_i32_0 : i32, i32
  }
  func.func @transform_2(%arg0: i32) -> (i32, i32) {
    %c0_i32 = arith.constant 0 : i32
    %c0_i32_0 = arith.constant 0 : i32
    %c0_i32_1 = arith.constant 0 : i32
    return %c0_i32, %c0_i32_0 : i32, i32
  }
  func.func @transform_3(%arg0: i32) -> (i32, i32) {
    %c0_i32 = arith.constant 0 : i32
    %c0_i32_0 = arith.constant 0 : i32
    return %arg0, %c0_i32 : i32, i32
  }
  func.func @transform_4(%arg0: i32) -> (i32, i32) {
    %c0_i32 = arith.constant 0 : i32
    %c0_i32_0 = arith.constant 0 : i32
    return %arg0, %c0_i32 : i32, i32
  }
}

</mosaic_0001>

<bundles_post_ra>
// kernel: bert_self_output.1
= control target key start
LH: loop header
LB: loop body
LE: loop exit
PB: predicated region body
PF: predicated region fallthrough
CT: control target
= control target key end

     0   :  { %9 = vsyncpa [#allocation3], 0  ;;  %s971_s0 = inlined_call_operand.hbm [shape: f32[16,32], index: 0, kind: input, shape index: {}]   ;;  %s972_s1 = inlined_call_operand.vmem [shape: f32[32,32], index: 1, kind: input, shape index: {}]   ;;  %s973_s2 = inlined_call_operand.vmem [shape: f32[3,32], index: 2, kind: input, shape index: {}]   ;;  %s974_s3 = inlined_call_operand.hbm [shape: f32[16,32], index: 3, kind: input, shape index: {}]   ;;  %s975_s4 = inlined_call_operand.hbm [shape: f32[16,32], index: 4, kind: output, shape index: {}]  }
   0x1   :  { %11 = vsyncpa [#allocation3 + $0x1], 0 }
   0x2   :  { %12 = vsyncpa [#allocation6], 0 }
   0x3   :  { %14 = vsyncpa [#allocation6 + $0x1], 0 }
   0x4   :  { %15 = vsyncpa [#allocation4], 0 }
   0x5   :  { %17 = vsyncpa [#allocation4 + $0x1], 0  ;;  %s732_s15 = smov 0   ;;  %s734_s16 = smov 0  }
   0x6   :  { %s736_s17 = smov 0   ;;  %s738_s18 = smov 0  }
   0x7 LB: > { %s753_s19 = sadd.s32 4294967295, %s699_s18   ;;  %s472_s20 = sadd.s32 4294967294, %s699_s18   ;;  %s699_s18 = sphi %s738_s18, %s994_s18   ;;  %s695_s17 = sphi %s736_s17, %s993_s17   ;;  %s691_s16 = sphi %s734_s16, %s992_s16   ;;  %s687_s15 = sphi %s732_s15, %s991_s15  }
   0x8   : > { %s757_s21 = sadd.s32 1, %s699_s18   ;;  %s30_s22 = sadd.s32 1, %s695_s17 }
   0x9   : > { %s27_s23 = ssub.s32 %s699_s18, %s757_s21  ;;  %p37_p0 = scmp.ne.s32.totalorder %s695_s17, %s691_s16 }
   0xa   : > { %p28_p1 = scmp.eq.s32.totalorder %s27_s23, 0  ;;  %p38_p2 = scmp.eq.s32.totalorder %s699_s18, 0 }
   0xb   : > { %p43_p3 = scmp.ne.s32.totalorder %s691_s16, %s687_s15  ;;  %p44_p4 = scmp.eq.s32.totalorder %s753_s19, 0 }
   0xc   : > { %s769_s24 = scalar_select %p28_p1, %s695_s17, %s30_s22  }
   0xd   : > { %p771_p5 = por %p38_p2, %p37_p0  ;;  %p775_p6 = por %p44_p4, %p43_p3 }
   0xe   : > { %p135_p7 = scmp.eq.s32.totalorder %s753_s19, 1  ;;  %p141_p8 = scmp.eq.s32.totalorder %s472_s20, 1 }
   0xf   : > { %s979_s26 = scalar_select %p775_p6, 1, 0 }
  0x10   : > { %p530_p10 = scmp.lt.s32.totalorder %s699_s18, 2  ;;  %p782_p11 = por %p135_p7, %p37_p0 }
  0x11   : > { %p786_p12 = por %p141_p8, %p43_p3  ;;  %s791_s29 = sand.u32 1, %s695_s17  }
  0x12   : > { %s980_s27 = scalar_select %p782_p11, 1, 0 }
  0x13   : > { %s981_s28 = scalar_select %p786_p12, 1, 0 }
  0x14   : > { %s476_s30 = sshll.u32 %s699_s18, 7  ;;  %s475_s5 = sshll.u32 %s791_s29, 3 }
  0x15   : > { %s800_s8 = scalar_lea.hbm %s971_s0, %s476_s30  ;;  %s171_s9 = scalar_lea.vmem [#allocation2], %s475_s5 }
  0x16   : > { %s178_s10 = sshll.u32 %s171_s9, 4  ;;  %p806_p13 = pnand %p530_p10, %p771_p5  ;;  %s810_s10 = int_to_ptr.vmem [resolvable:$true] %s178_s10 }
  0x17   : > { %s168_s12 = scalar_lea.sflag [#allocation3], %s791_s29  ;;  %s569_s13 = scalar_lea.hbm %s800_s8, 128 }
  0x18   : > { %p570_p2 = scmp.ne.s32.totalorder %s800_s8, %s569_s13  ;;  %p571_p3 = pneg %p806_p13 }
  0x19   : > { %s574_s22 = scalar_lea.hbm %s971_s0, 256  ;;  %p575_p5 = scmp.lt.u32.totalorder %s800_s8, %s971_s0 }
  0x1a   : > { %p572_p4 = pnand %p571_p3, %p570_p2  ;;  %p576_p8 = scmp.lt.u32.totalorder %s574_s22, %s569_s13 }
  0x1b   : > { %p578_p9 = scmp.lt.u32.totalorder %s569_s13, %s800_s8 }
  0x1c   : > { %p573_p7 = pneg %p572_p4  ;;  %p577_p10 = por %p576_p8, %p575_p5 }
  0x1e   : > { %p579_p0 = por %p578_p9, %p577_p10 }
  0x20   : > { %p580_p1 = pnand %p579_p0, %p573_p7 }
  0x22   : > { %583 = shalt.err (!%p580_p1)
}
  0x23   : > { %s584_s6 = scalar_lea.vmem %s810_s10, 128  ;;  %s701_s7 = smov [#allocation2]  }
  0x24   : > { %p585_p2 = scmp.ne.s32.totalorder %s810_s10, %s584_s6  ;;  %s589_s9 = sshll.u32 %s701_s7, 4  ;;  %s590_s9 = int_to_ptr.vmem [resolvable:$false] %s589_s9 }
  0x25   : > { %s591_s14 = scalar_lea.vmem %s590_s9, 256  ;;  %p592_p11 = scmp.lt.s32.totalorder %s810_s10, %s590_s9 }
  0x26   : > { %p587_p4 = pnand %p585_p2, %p571_p3  ;;  %p593_p5 = scmp.lt.s32.totalorder %s591_s14, %s584_s6 }
  0x28   : > { %p588_p12 = pneg %p587_p4  ;;  %p594_p8 = por %p593_p5, %p592_p11 }
  0x2a   : > { %p595_p9 = pnand %p594_p8, %p588_p12 }
  0x2c   : > { %598 = shalt.err (!%p595_p9)
}
  0x2d   : > { %522 = dma.hbm_to_vmem [thread:$0]  (!%p806_p13), %s800_s8, 128, %s810_s10, %s168_s12  }
  0x2e   : > { %p983_p0 = scmp.lt.s32.totalorder %s699_s18, 3  ;;  %p984_p1 = scmp.ge.s32.totalorder %s699_s18, 1 }
  0x2f   : > { %s853_s23 = scalar_lea.hbm %s974_s3, %s476_s30  ;;  %s189_s25 = scalar_lea.vmem [#allocation5], %s475_s5 }
  0x30   : > { %p844_p7 = pnand %p984_p1, %p983_p0  ;;  %s196_s6 = sshll.u32 %s189_s25, 4  ;;  %s197_s6 = int_to_ptr.vmem [resolvable:$true] %s196_s6 }
  0x31   : > { %s186_s8 = scalar_lea.sflag [#allocation6], %s791_s29  ;;  %s599_s10 = scalar_lea.hbm %s853_s23, 128 }
  0x32   : > { %s985_s13 = scalar_select %p844_p7, 1, 0 }
  0x33   : > { %p600_p11 = scmp.ne.s32.totalorder %s853_s23, %s599_s10  ;;  %s604_s30 = scalar_lea.hbm %s974_s3, 256 }
  0x34   : > { %p605_p2 = scmp.lt.u32.totalorder %s853_s23, %s974_s3  ;;  %p606_p4 = scmp.lt.u32.totalorder %s604_s30, %s599_s10 }
  0x35   : > { %p602_p12 = pnand %p600_p11, %p571_p3  ;;  %p608_p8 = scmp.lt.u32.totalorder %s599_s10, %s853_s23 }
  0x36   : > { %p607_p5 = por %p606_p4, %p605_p2 }
  0x37   : > { %p603_p10 = pneg %p602_p12 }
  0x38   : > { %p609_p9 = por %p608_p8, %p607_p5 }
  0x3a   : > { %p610_p0 = pnand %p609_p9, %p603_p10 }
  0x3c   : > { %613 = shalt.err (!%p610_p0)
}
  0x3d   : > { %s614_s29 = scalar_lea.vmem %s197_s6, 128  ;;  %s702_s5 = smov [#allocation5]  }
  0x3e   : > { %p615_p1 = scmp.ne.s32.totalorder %s197_s6, %s614_s29  ;;  %s619_s20 = sshll.u32 %s702_s5, 4  ;;  %s620_s20 = int_to_ptr.vmem [resolvable:$false] %s619_s20 }
  0x3f   : > { %s621_s22 = scalar_lea.vmem %s620_s20, 256  ;;  %p622_p6 = scmp.lt.s32.totalorder %s197_s6, %s620_s20 }
  0x40   : > { %p617_p11 = pnand %p615_p1, %p571_p3  ;;  %p623_p7 = scmp.lt.s32.totalorder %s621_s22, %s614_s29 }
  0x42   : > { %p618_p12 = pneg %p617_p11  ;;  %p624_p2 = por %p623_p7, %p622_p6 }
  0x44   : > { %p625_p4 = pnand %p624_p2, %p618_p12 }
  0x46   : > { %628 = shalt.err (!%p625_p4)
}
  0x47   : > { %525 = dma.hbm_to_vmem [thread:$0]  (!%p806_p13), %s853_s23, 128, %s197_s6, %s186_s8  }
  0x48   : > { %p986_p10 = scmp.ne.s32.totalorder %s985_s13, 0 }
  0x49   : > { %s880_s25 = sand.u32 (!%p986_p10), 1, %s691_s16   ;;  %p987_p6 = scmp.ne.s32.totalorder (!%p986_p10), %s979_s26, 0 }
  0x4a   : > { %205 = sbr.rel (%p986_p10) target bundleno = 496 (0x1f0), region = 36  ;;  %s883_s10 = sshll.u32 (!%p986_p10), %s880_s25, 3 }
  0x4b   : > { %s208_s12 = scalar_lea.sflag (!%p986_p10), [#allocation3], %s880_s25  ;;  %s211_s7 = scalar_lea.vmem (!%p986_p10), [#allocation2], %s883_s10 }
  0x51   : > { %674 = dma.done.wait (%p987_p6), %s208_s12, 128  }
  0x52   : > { %676 = vsyncadd (%p987_p6), %s208_s12, 4294967168  ;;  %s217_s11 = scalar_lea.sflag [#allocation6], %s880_s25  ;;  %s220_s13 = scalar_lea.vmem [#allocation5], %s883_s10 }
  0x53   : > { %678 = dma.done.wait (%p987_p6), %s217_s11, 128  }
  0x54   : > { %680 = vsyncadd (%p987_p6), %s217_s11, 4294967168  ;;  %v703_v0 = vmov 0.0|0.0   ;;  %vm704_vm0 = vmmov 0   ;;  %v705_v1 = vmov 0.0   ;;  %v251_v2 = vld [vmem:[%s972_s1] sm:$0xff]  ;;  %v252_v3 = vld [vmem:[%s972_s1 + $0x8] sm:$0xff] }
  0x55   : > { %507 = vmatprep.subr.bf16.mxu0 %v703_v0  ;;  %504 = vmatprep.mubr.msk.f32.mxu0 %vm704_vm0, %v705_v1  ;;  %v253_v4 = vld [vmem:[%s972_s1 + $0x10] sm:$0xff]  ;;  %v508_v5 = vpack.c.bf16 %v252_v3, %v251_v2  ;;  %v254_v6 = vld [vmem:[%s972_s1 + $0x18] sm:$0xff]  ;;  %v250_v8 = vld [vmem:[%s211_s7] sm:$0xff]  ;;  %vm262_vm1 = vcmask 261120   ;;  %s249_s23 = scalar_lea.vmem [#allocation7], %s883_s10  ;;  %s366_s14 = scalar_lea.sflag [#allocation4], %s880_s25 }
  0x56   : > { %v511_v7 = vpack.c.bf16 %v254_v6, %v253_v4  ;;  %v483_v9 = vld [vmem:[%s973_s2] ss:$0 sm:$0xff]  ;;  %v336_v11 = vld [vmem:[%s220_s13] sm:$0xff]  ;;  %v485_v26 = vld [vmem:[%s973_s2 + $0x1] ss:$0 sm:$0xff]  ;;  %s488_s13 = sshll.u32 %s753_s19, 7 }
  0x57   : > { %509 = vmatpush3.bf16.msra.mxu0 %v508_v5  ;;  %v486_v30 = vld [vmem:[%s973_s2 + $0x2] ss:$0 sm:$0xff]  ;;  %s379_s6 = sshll.u32 %s249_s23, 4  ;;  %s926_s9 = scalar_lea.hbm %s975_s4, %s488_s13  ;;  %s928_s6 = int_to_ptr.vmem [resolvable:$true] %s379_s6 }
  0x58   : > { %510 = vmatprep.subr.bf16.mxu0 %v703_v0  ;;  %s629_s26 = scalar_lea.vmem %s928_s6, 128  ;;  %p988_p3 = scmp.ne.s32.totalorder %s980_s27, 0 }
  0x59   : > { %p630_p13 = scmp.ne.s32.totalorder %s928_s6, %s629_s26  ;;  %s706_s19 = smov [#allocation7]  }
  0x5a   : > { %s633_s10 = sshll.u32 %s706_s19, 4  ;;  %s634_s10 = int_to_ptr.vmem [resolvable:$false] %s633_s10 }
  0x5b   : > { %512 = vmatpush3.bf16.msra.mxu0 %v511_v7  ;;  %p631_p7 = pnand %p630_p13, %p988_p3  ;;  %s635_s29 = scalar_lea.vmem %s634_s10, 256 }
  0x5c   : > { %p636_p8 = scmp.lt.s32.totalorder %s928_s6, %s634_s10  ;;  %p637_p9 = scmp.lt.s32.totalorder %s635_s29, %s629_s26 }
  0x5d   : > { %p632_p5 = pneg %p631_p7 }
  0x5e   : > { %505 = vmatmul.mubr.msk.f32.vlgmr.msra.gmra.mrb[0].mxu0 %vm262_vm1, %v250_v8  ;;  %p638_p0 = por %p637_p9, %p636_p8 }
  0x60   : > { %p639_p1 = pnand %p638_p0, %p632_p5 }
 0x131   : > { %v332_v10 = vpop.f32.mrb[0].mxu0 }
 0x132   : > { %v333_v12 = vadd.f32 %v483_v9, %v332_v10  ;;  %v506_v13 = vpop.f32.mrb[1].mxu0 }
 0x134   : > { %v337_v14 = vadd.f32 %v336_v11, %v333_v12 }
 0x136   : > { %v338_v15 = vsel %vm262_vm1, %v337_v14, 0.0  ;;  %v342_v16 = vmul.f32 %v337_v14, %v337_v14 }
 0x137   : > { %339 = vadd.xlane.f32.xlu0 %v338_v15 }
 0x138   : > { %v343_v17 = vsel %vm262_vm1, %v342_v16, 0.0 }
 0x13b   : > { %344 = vadd.xlane.f32.xlu0 %v343_v17 }
 0x1c4   : > { %v340_v18 = vpop.xlane.xlu0 %339 }
 0x1c5   : > { %v341_v19 = vmul.f32 0.03125, %v340_v18 }
 0x1c7   : > { %v347_v21 = vmul.f32 %v341_v19, %v341_v19  ;;  %v352_v28 = vsub.f32 %v337_v14, %v341_v19 }
 0x1c8   : > { %v345_v20 = vpop.xlane.xlu0 %344 }
 0x1c9   : > { %v346_v22 = vmul.f32 0.03125, %v345_v20 }
 0x1cb   : > { %v348_v23 = vsub.f32 %v346_v22, %v347_v21 }
 0x1cd   : > { %v349_v24 = vmax.f32 %v348_v23, 0.0 }
 0x1cf   : > { %v350_v25 = vadd.f32 1e-12, %v349_v24 }
 0x1d1   : > { %567 = vrsqrt.f32 %v350_v25 }
 0x1db   : > { %v568_v27 = vpop.eup %567 }
 0x1dc   : > { %v357_v29 = vmul.f32 %v568_v27, %v485_v26 }
 0x1de   : > { %v358_v31 = vmul.f32 %v357_v29, %v352_v28 }
 0x1e0   : > { %v363_v32 = vadd.f32 %v486_v30, %v358_v31 }
 0x1e2   : > { %364 = vst.msk [vmem:[%s249_s23] sm:$0xff] %vm262_vm1, %v363_v32 }
 0x1e3   : > { %642 = shalt.err (!%p639_p1)
}
 0x1e4   : > { %s643_s25 = scalar_lea.hbm %s926_s9, 128  ;;  %s647_s22 = scalar_lea.hbm %s975_s4, 256 }
 0x1e5   : > { %p644_p11 = scmp.ne.s32.totalorder %s926_s9, %s643_s25  ;;  %p648_p4 = scmp.lt.u32.totalorder %s926_s9, %s975_s4 }
 0x1e6   : > { %p649_p10 = scmp.lt.u32.totalorder %s647_s22, %s643_s25  ;;  %p651_p13 = scmp.lt.u32.totalorder %s643_s25, %s926_s9 }
 0x1e7   : > { %p645_p12 = pnand %p644_p11, %p988_p3 }
 0x1e8   : > { %p650_p6 = por %p649_p10, %p648_p4 }
 0x1e9   : > { %p646_p2 = pneg %p645_p12 }
 0x1ea   : > { %p652_p7 = por %p651_p13, %p650_p6 }
 0x1ec   : > { %p653_p5 = pnand %p652_p7, %p646_p2 }
 0x1ee   : > { %656 = shalt.err (!%p653_p5)
}
 0x1ef   : > { %517 = dma.vmem_to_hbm [thread:$0]  (%p988_p3), %s928_s6, 128, %s926_s9, %s366_s14  }
 0x1f0 PF: > { %s391_s11 = sand.u32 1, %s687_s15   ;;  %p989_p8 = scmp.ne.s32.totalorder %s981_s28, 0 }
 0x1f1   : > { %p990_p9 = scmp.ge.s32.totalorder %s699_s18, 2  ;;  %s392_s13 = scalar_lea.sflag [#allocation4], %s391_s11 }
 0x1f3   : > { %p527_p0 = pnand %p990_p9, %p989_p8 }
 0x1f5   : > { %682 = dma.done.wait (!%p527_p0), %s392_s13, 128  }
 0x1f6   : > { %684 = vsyncadd (!%p527_p0), %s392_s13, 4294967168  ;;  %p20_p1 = scmp.ge.s32.totalorder %s757_s21, 4   ;;  %s991_s15 = smov %s691_s16 }
 0x1f7   : > { %s992_s16 = smov %s695_s17  ;;  %s993_s17 = smov %s769_s24 }
 0x1f8   : > { %s994_s18 = smov %s757_s21  ;;  %22 = sbr.rel (!%p20_p1) target bundleno = 7 (0x7), region = 94 }
 0x1ff   :  { %397 = vsyncpa [#allocation3], 1 }
 0x200   :  { %399 = vsyncpa [#allocation3 + $0x1], 1 }
 0x201   :  { %400 = vsyncpa [#allocation6], 1 }
 0x202   :  { %402 = vsyncpa [#allocation6 + $0x1], 1 }
 0x203   :  { %403 = vsyncpa [#allocation4], 1 }
 0x204   :  { %405 = vsyncpa [#allocation4 + $0x1], 1 }

// kernel: bert_self_output.1
= control target key start
LH: loop header
LB: loop body
LE: loop exit
PB: predicated region body
PF: predicated region fallthrough
CT: control target
= control target key end

     0   :  { %9 = vsyncpa [#allocation3], 0  ;;  %s971_s0 = inlined_call_operand.hbm [shape: f32[16,32], index: 0, kind: input, shape index: {}]   ;;  %s972_s1 = inlined_call_operand.vmem [shape: f32[32,32], index: 1, kind: input, shape index: {}]   ;;  %s973_s2 = inlined_call_operand.vmem [shape: f32[3,32], index: 2, kind: input, shape index: {}]   ;;  %s974_s3 = inlined_call_operand.hbm [shape: f32[16,32], index: 3, kind: input, shape index: {}]   ;;  %s975_s4 = inlined_call_operand.hbm [shape: f32[16,32], index: 4, kind: output, shape index: {}]  }
   0x1   :  { %11 = vsyncpa [#allocation3 + $0x1], 0 }
   0x2   :  { %12 = vsyncpa [#allocation6], 0 }
   0x3   :  { %14 = vsyncpa [#allocation6 + $0x1], 0 }
   0x4   :  { %15 = vsyncpa [#allocation4], 0 }
   0x5   :  { %17 = vsyncpa [#allocation4 + $0x1], 0  ;;  %s732_s15 = smov 0   ;;  %s734_s16 = smov 0  }
   0x6   :  { %s736_s17 = smov 0   ;;  %s738_s18 = smov 0  }
   0x7 LB: > { %s753_s19 = sadd.s32 4294967295, %s699_s18   ;;  %s472_s20 = sadd.s32 4294967294, %s699_s18   ;;  %s699_s18 = sphi %s738_s18, %s994_s18   ;;  %s695_s17 = sphi %s736_s17, %s993_s17   ;;  %s691_s16 = sphi %s734_s16, %s992_s16   ;;  %s687_s15 = sphi %s732_s15, %s991_s15  }
   0x8   : > { %s757_s21 = sadd.s32 1, %s699_s18   ;;  %s30_s22 = sadd.s32 1, %s695_s17 }
   0x9   : > { %s27_s23 = ssub.s32 %s699_s18, %s757_s21  ;;  %p37_p0 = scmp.ne.s32.totalorder %s695_s17, %s691_s16 }
   0xa   : > { %p28_p1 = scmp.eq.s32.totalorder %s27_s23, 0  ;;  %p38_p2 = scmp.eq.s32.totalorder %s699_s18, 0 }
   0xb   : > { %p43_p3 = scmp.ne.s32.totalorder %s691_s16, %s687_s15  ;;  %p44_p4 = scmp.eq.s32.totalorder %s753_s19, 0 }
   0xc   : > { %s769_s24 = scalar_select %p28_p1, %s695_s17, %s30_s22  }
   0xd   : > { %p771_p5 = por %p38_p2, %p37_p0  ;;  %p775_p6 = por %p44_p4, %p43_p3 }
   0xe   : > { %p135_p7 = scmp.eq.s32.totalorder %s753_s19, 1  ;;  %p141_p8 = scmp.eq.s32.totalorder %s472_s20, 1 }
   0xf   : > { %s979_s26 = scalar_select %p775_p6, 1, 0 }
  0x10   : > { %p530_p10 = scmp.lt.s32.totalorder %s699_s18, 2  ;;  %p782_p11 = por %p135_p7, %p37_p0 }
  0x11   : > { %p786_p12 = por %p141_p8, %p43_p3  ;;  %s791_s29 = sand.u32 1, %s695_s17  }
  0x12   : > { %s980_s27 = scalar_select %p782_p11, 1, 0 }
  0x13   : > { %s981_s28 = scalar_select %p786_p12, 1, 0 }
  0x14   : > { %s476_s30 = sshll.u32 %s699_s18, 7  ;;  %s475_s5 = sshll.u32 %s791_s29, 3 }
  0x15   : > { %s800_s8 = scalar_lea.hbm %s971_s0, %s476_s30  ;;  %s171_s9 = scalar_lea.vmem [#allocation2], %s475_s5 }
  0x16   : > { %s178_s10 = sshll.u32 %s171_s9, 4  ;;  %p806_p13 = pnand %p530_p10, %p771_p5  ;;  %s810_s10 = int_to_ptr.vmem [resolvable:$true] %s178_s10 }
  0x17   : > { %s168_s12 = scalar_lea.sflag [#allocation3], %s791_s29  ;;  %s569_s13 = scalar_lea.hbm %s800_s8, 128 }
  0x18   : > { %p570_p2 = scmp.ne.s32.totalorder %s800_s8, %s569_s13  ;;  %p571_p3 = pneg %p806_p13 }
  0x19   : > { %s574_s22 = scalar_lea.hbm %s971_s0, 256  ;;  %p575_p5 = scmp.lt.u32.totalorder %s800_s8, %s971_s0 }
  0x1a   : > { %p572_p4 = pnand %p571_p3, %p570_p2  ;;  %p576_p8 = scmp.lt.u32.totalorder %s574_s22, %s569_s13 }
  0x1b   : > { %p578_p9 = scmp.lt.u32.totalorder %s569_s13, %s800_s8 }
  0x1c   : > { %p573_p7 = pneg %p572_p4  ;;  %p577_p10 = por %p576_p8, %p575_p5 }
  0x1e   : > { %p579_p0 = por %p578_p9, %p577_p10 }
  0x20   : > { %p580_p1 = pnand %p579_p0, %p573_p7 }
  0x22   : > { %583 = shalt.err (!%p580_p1)
}
  0x23   : > { %s584_s6 = scalar_lea.vmem %s810_s10, 128  ;;  %s701_s7 = smov [#allocation2]  }
  0x24   : > { %p585_p2 = scmp.ne.s32.totalorder %s810_s10, %s584_s6  ;;  %s589_s9 = sshll.u32 %s701_s7, 4  ;;  %s590_s9 = int_to_ptr.vmem [resolvable:$false] %s589_s9 }
  0x25   : > { %s591_s14 = scalar_lea.vmem %s590_s9, 256  ;;  %p592_p11 = scmp.lt.s32.totalorder %s810_s10, %s590_s9 }
  0x26   : > { %p587_p4 = pnand %p585_p2, %p571_p3  ;;  %p593_p5 = scmp.lt.s32.totalorder %s591_s14, %s584_s6 }
  0x28   : > { %p588_p12 = pneg %p587_p4  ;;  %p594_p8 = por %p593_p5, %p592_p11 }
  0x2a   : > { %p595_p9 = pnand %p594_p8, %p588_p12 }
  0x2c   : > { %598 = shalt.err (!%p595_p9)
}
  0x2d   : > { %522 = dma.hbm_to_vmem [thread:$0]  (!%p806_p13), %s800_s8, 128, %s810_s10, %s168_s12  }
  0x2e   : > { %p983_p0 = scmp.lt.s32.totalorder %s699_s18, 3  ;;  %p984_p1 = scmp.ge.s32.totalorder %s699_s18, 1 }
  0x2f   : > { %s853_s23 = scalar_lea.hbm %s974_s3, %s476_s30  ;;  %s189_s25 = scalar_lea.vmem [#allocation5], %s475_s5 }
  0x30   : > { %p844_p7 = pnand %p984_p1, %p983_p0  ;;  %s196_s6 = sshll.u32 %s189_s25, 4  ;;  %s197_s6 = int_to_ptr.vmem [resolvable:$true] %s196_s6 }
  0x31   : > { %s186_s8 = scalar_lea.sflag [#allocation6], %s791_s29  ;;  %s599_s10 = scalar_lea.hbm %s853_s23, 128 }
  0x32   : > { %s985_s13 = scalar_select %p844_p7, 1, 0 }
  0x33   : > { %p600_p11 = scmp.ne.s32.totalorder %s853_s23, %s599_s10  ;;  %s604_s30 = scalar_lea.hbm %s974_s3, 256 }
  0x34   : > { %p605_p2 = scmp.lt.u32.totalorder %s853_s23, %s974_s3  ;;  %p606_p4 = scmp.lt.u32.totalorder %s604_s30, %s599_s10 }
  0x35   : > { %p602_p12 = pnand %p600_p11, %p571_p3  ;;  %p608_p8 = scmp.lt.u32.totalorder %s599_s10, %s853_s23 }
  0x36   : > { %p607_p5 = por %p606_p4, %p605_p2 }
  0x37   : > { %p603_p10 = pneg %p602_p12 }
  0x38   : > { %p609_p9 = por %p608_p8, %p607_p5 }
  0x3a   : > { %p610_p0 = pnand %p609_p9, %p603_p10 }
  0x3c   : > { %613 = shalt.err (!%p610_p0)
}
  0x3d   : > { %s614_s29 = scalar_lea.vmem %s197_s6, 128  ;;  %s702_s5 = smov [#allocation5]  }
  0x3e   : > { %p615_p1 = scmp.ne.s32.totalorder %s197_s6, %s614_s29  ;;  %s619_s20 = sshll.u32 %s702_s5, 4  ;;  %s620_s20 = int_to_ptr.vmem [resolvable:$false] %s619_s20 }
  0x3f   : > { %s621_s22 = scalar_lea.vmem %s620_s20, 256  ;;  %p622_p6 = scmp.lt.s32.totalorder %s197_s6, %s620_s20 }
  0x40   : > { %p617_p11 = pnand %p615_p1, %p571_p3  ;;  %p623_p7 = scmp.lt.s32.totalorder %s621_s22, %s614_s29 }
  0x42   : > { %p618_p12 = pneg %p617_p11  ;;  %p624_p2 = por %p623_p7, %p622_p6 }
  0x44   : > { %p625_p4 = pnand %p624_p2, %p618_p12 }
  0x46   : > { %628 = shalt.err (!%p625_p4)
}
  0x47   : > { %525 = dma.hbm_to_vmem [thread:$0]  (!%p806_p13), %s853_s23, 128, %s197_s6, %s186_s8  }
  0x48   : > { %p986_p10 = scmp.ne.s32.totalorder %s985_s13, 0 }
  0x49   : > { %s880_s25 = sand.u32 (!%p986_p10), 1, %s691_s16   ;;  %p987_p6 = scmp.ne.s32.totalorder (!%p986_p10), %s979_s26, 0 }
  0x4a   : > { %205 = sbr.rel (%p986_p10) target bundleno = 496 (0x1f0), region = 36  ;;  %s883_s10 = sshll.u32 (!%p986_p10), %s880_s25, 3 }
  0x4b   : > { %s208_s12 = scalar_lea.sflag (!%p986_p10), [#allocation3], %s880_s25  ;;  %s211_s7 = scalar_lea.vmem (!%p986_p10), [#allocation2], %s883_s10 }
  0x51   : > { %674 = dma.done.wait (%p987_p6), %s208_s12, 128  }
  0x52   : > { %676 = vsyncadd (%p987_p6), %s208_s12, 4294967168  ;;  %s217_s11 = scalar_lea.sflag [#allocation6], %s880_s25  ;;  %s220_s13 = scalar_lea.vmem [#allocation5], %s883_s10 }
  0x53   : > { %678 = dma.done.wait (%p987_p6), %s217_s11, 128  }
  0x54   : > { %680 = vsyncadd (%p987_p6), %s217_s11, 4294967168  ;;  %v703_v0 = vmov 0.0|0.0   ;;  %vm704_vm0 = vmmov 0   ;;  %v705_v1 = vmov 0.0   ;;  %v251_v2 = vld [vmem:[%s972_s1] sm:$0xff]  ;;  %v252_v3 = vld [vmem:[%s972_s1 + $0x8] sm:$0xff] }
  0x55   : > { %507 = vmatprep.subr.bf16.mxu0 %v703_v0  ;;  %504 = vmatprep.mubr.msk.f32.mxu0 %vm704_vm0, %v705_v1  ;;  %v253_v4 = vld [vmem:[%s972_s1 + $0x10] sm:$0xff]  ;;  %v508_v5 = vpack.c.bf16 %v252_v3, %v251_v2  ;;  %v254_v6 = vld [vmem:[%s972_s1 + $0x18] sm:$0xff]  ;;  %v250_v8 = vld [vmem:[%s211_s7] sm:$0xff]  ;;  %vm262_vm1 = vcmask 261120   ;;  %s249_s23 = scalar_lea.vmem [#allocation7], %s883_s10  ;;  %s366_s14 = scalar_lea.sflag [#allocation4], %s880_s25 }
  0x56   : > { %v511_v7 = vpack.c.bf16 %v254_v6, %v253_v4  ;;  %v483_v9 = vld [vmem:[%s973_s2] ss:$0 sm:$0xff]  ;;  %v336_v11 = vld [vmem:[%s220_s13] sm:$0xff]  ;;  %v485_v26 = vld [vmem:[%s973_s2 + $0x1] ss:$0 sm:$0xff]  ;;  %s488_s13 = sshll.u32 %s753_s19, 7 }
  0x57   : > { %509 = vmatpush3.bf16.msra.mxu0 %v508_v5  ;;  %v486_v30 = vld [vmem:[%s973_s2 + $0x2] ss:$0 sm:$0xff]  ;;  %s379_s6 = sshll.u32 %s249_s23, 4  ;;  %s926_s9 = scalar_lea.hbm %s975_s4, %s488_s13  ;;  %s928_s6 = int_to_ptr.vmem [resolvable:$true] %s379_s6 }
  0x58   : > { %510 = vmatprep.subr.bf16.mxu0 %v703_v0  ;;  %s629_s26 = scalar_lea.vmem %s928_s6, 128  ;;  %p988_p3 = scmp.ne.s32.totalorder %s980_s27, 0 }
  0x59   : > { %p630_p13 = scmp.ne.s32.totalorder %s928_s6, %s629_s26  ;;  %s706_s19 = smov [#allocation7]  }
  0x5a   : > { %s633_s10 = sshll.u32 %s706_s19, 4  ;;  %s634_s10 = int_to_ptr.vmem [resolvable:$false] %s633_s10 }
  0x5b   : > { %512 = vmatpush3.bf16.msra.mxu0 %v511_v7  ;;  %p631_p7 = pnand %p630_p13, %p988_p3  ;;  %s635_s29 = scalar_lea.vmem %s634_s10, 256 }
  0x5c   : > { %p636_p8 = scmp.lt.s32.totalorder %s928_s6, %s634_s10  ;;  %p637_p9 = scmp.lt.s32.totalorder %s635_s29, %s629_s26 }
  0x5d   : > { %p632_p5 = pneg %p631_p7 }
  0x5e   : > { %505 = vmatmul.mubr.msk.f32.vlgmr.msra.gmra.mrb[0].mxu0 %vm262_vm1, %v250_v8  ;;  %p638_p0 = por %p637_p9, %p636_p8 }
  0x60   : > { %p639_p1 = pnand %p638_p0, %p632_p5 }
 0x131   : > { %v332_v10 = vpop.f32.mrb[0].mxu0 }
 0x132   : > { %v333_v12 = vadd.f32 %v483_v9, %v332_v10  ;;  %v506_v13 = vpop.f32.mrb[1].mxu0 }
 0x134   : > { %v337_v14 = vadd.f32 %v336_v11, %v333_v12 }
 0x136   : > { %v338_v15 = vsel %vm262_vm1, %v337_v14, 0.0  ;;  %v342_v16 = vmul.f32 %v337_v14, %v337_v14 }
 0x137   : > { %339 = vadd.xlane.f32.xlu0 %v338_v15 }
 0x138   : > { %v343_v17 = vsel %vm262_vm1, %v342_v16, 0.0 }
 0x13b   : > { %344 = vadd.xlane.f32.xlu0 %v343_v17 }
 0x1c4   : > { %v340_v18 = vpop.xlane.xlu0 %339 }
 0x1c5   : > { %v341_v19 = vmul.f32 0.03125, %v340_v18 }
 0x1c7   : > { %v347_v21 = vmul.f32 %v341_v19, %v341_v19  ;;  %v352_v28 = vsub.f32 %v337_v14, %v341_v19 }
 0x1c8   : > { %v345_v20 = vpop.xlane.xlu0 %344 }
 0x1c9   : > { %v346_v22 = vmul.f32 0.03125, %v345_v20 }
 0x1cb   : > { %v348_v23 = vsub.f32 %v346_v22, %v347_v21 }
 0x1cd   : > { %v349_v24 = vmax.f32 %v348_v23, 0.0 }
 0x1cf   : > { %v350_v25 = vadd.f32 1e-12, %v349_v24 }
 0x1d1   : > { %567 = vrsqrt.f32 %v350_v25 }
 0x1db   : > { %v568_v27 = vpop.eup %567 }
 0x1dc   : > { %v357_v29 = vmul.f32 %v568_v27, %v485_v26 }
 0x1de   : > { %v358_v31 = vmul.f32 %v357_v29, %v352_v28 }
 0x1e0   : > { %v363_v32 = vadd.f32 %v486_v30, %v358_v31 }
 0x1e2   : > { %364 = vst.msk [vmem:[%s249_s23] sm:$0xff] %vm262_vm1, %v363_v32 }
 0x1e3   : > { %642 = shalt.err (!%p639_p1)
}
 0x1e4   : > { %s643_s25 = scalar_lea.hbm %s926_s9, 128  ;;  %s647_s22 = scalar_lea.hbm %s975_s4, 256 }
 0x1e5   : > { %p644_p11 = scmp.ne.s32.totalorder %s926_s9, %s643_s25  ;;  %p648_p4 = scmp.lt.u32.totalorder %s926_s9, %s975_s4 }
 0x1e6   : > { %p649_p10 = scmp.lt.u32.totalorder %s647_s22, %s643_s25  ;;  %p651_p13 = scmp.lt.u32.totalorder %s643_s25, %s926_s9 }
 0x1e7   : > { %p645_p12 = pnand %p644_p11, %p988_p3 }
 0x1e8   : > { %p650_p6 = por %p649_p10, %p648_p4 }
 0x1e9   : > { %p646_p2 = pneg %p645_p12 }
 0x1ea   : > { %p652_p7 = por %p651_p13, %p650_p6 }
 0x1ec   : > { %p653_p5 = pnand %p652_p7, %p646_p2 }
 0x1ee   : > { %656 = shalt.err (!%p653_p5)
}
 0x1ef   : > { %517 = dma.vmem_to_hbm [thread:$0]  (%p988_p3), %s928_s6, 128, %s926_s9, %s366_s14  }
 0x1f0 PF: > { %s391_s11 = sand.u32 1, %s687_s15   ;;  %p989_p8 = scmp.ne.s32.totalorder %s981_s28, 0 }
 0x1f1   : > { %p990_p9 = scmp.ge.s32.totalorder %s699_s18, 2  ;;  %s392_s13 = scalar_lea.sflag [#allocation4], %s391_s11 }
 0x1f3   : > { %p527_p0 = pnand %p990_p9, %p989_p8 }
 0x1f5   : > { %682 = dma.done.wait (!%p527_p0), %s392_s13, 128  }
 0x1f6   : > { %684 = vsyncadd (!%p527_p0), %s392_s13, 4294967168  ;;  %p20_p1 = scmp.ge.s32.totalorder %s757_s21, 4   ;;  %s991_s15 = smov %s691_s16 }
 0x1f7   : > { %s992_s16 = smov %s695_s17  ;;  %s993_s17 = smov %s769_s24 }
 0x1f8   : > { %s994_s18 = smov %s757_s21  ;;  %22 = sbr.rel (!%p20_p1) target bundleno = 7 (0x7), region = 94 }
 0x1ff   :  { %397 = vsyncpa [#allocation3], 1 }
 0x200   :  { %399 = vsyncpa [#allocation3 + $0x1], 1 }
 0x201   :  { %400 = vsyncpa [#allocation6], 1 }
 0x202   :  { %402 = vsyncpa [#allocation6 + $0x1], 1 }
 0x203   :  { %403 = vsyncpa [#allocation4], 1 }
 0x204   :  { %405 = vsyncpa [#allocation4 + $0x1], 1 }

</bundles_post_ra>
